<compile_context>
chip_gen: v6e
topology: v6e:2x2x1
jax: 0.10.0
libtpu: 0.0.40
codegen_flags: <defaults>
</compile_context>

<pallas_src>
import functools
from typing import NamedTuple

import jax
import jax.numpy as jnp
from jax import lax
from jax.experimental import pallas as pl
from jax.experimental.pallas import tpu as pltpu

_NEG_SLOPE = 0.2     # GATConv LeakyReLU slope
_NEG_BIG = -1e30     # finite "minus infinity": no inf - inf = NaN risk


def _align8(v):
    return ((v + 7) // 8) * 8


class _ParamLayout(NamedTuple):
    off_w1: int
    r1: int
    off_b1: int
    off_w2: int
    r2: int
    off_b2: int
    total: int
    pw: int


def _param_layout(f1, heads1, c1, heads2, c2):
    """Static row/col offsets of the single packed parameter buffer."""
    f2 = heads1 * c1
    r1 = heads1 * c1 + 2 * heads1          # layer-1 weight rows (feat|dst|src)
    r2 = heads2 * c2 + 2 * heads2          # layer-2 weight rows (feat|dst|src)
    off_w1 = 0
    off_b1 = _align8(off_w1 + r1)
    off_w2 = _align8(off_b1 + f2)
    off_b2 = _align8(off_w2 + r2)
    total = _align8(off_b2 + 1)
    pw = max(f1, f2, c2)
    return _ParamLayout(off_w1, r1, off_b1, off_w2, r2, off_b2, total, pw)


def _gat_layer(x_any, x_cdim, adj_pos, w_all, heads, c, *, out_transposed):
    """One GATConv layer, all heads batched.

    x_any : layer input; contraction (feature) axis is `x_cdim`.
            layer 1: [N, Fin] (x_cdim=1), layer 2: [Fin, N] (x_cdim=0).
    w_all : [H*C + 2H, Fin] rows = head-major feature weights | dst rows | src rows.
    Returns [H, C, N] if out_transposed else [H, N, C].
    """
    hc = heads * c
    # One wide MXU push: features (head-major rows) + src attention scores.
    z = lax.dot_general(w_all, x_any, (((1,), (x_cdim,)), ((), ())),
                        preferred_element_type=jnp.float32)        # [hc+2H, N]
    n = z.shape[1]
    feat_t = z[0:hc, :].reshape(heads, c, n)                        # [H, C, N]
    a_src = z[hc + heads:hc + 2 * heads, :]                         # [H, N]
    # Dst scores with nodes on sublanes (column orientation) via one tiny matmul.
    a_dst_t = lax.dot_general(x_any, w_all[hc:hc + heads, :],
                              (((x_cdim,), (1,)), ((), ())),
                              preferred_element_type=jnp.float32)   # [N, H]
    # Attention logits for ALL heads at once: e[h, i, j] = a_dst[i,h] + a_src[h,j].
    e = jnp.stack([a_dst_t[:, h:h + 1] + a_src[h:h + 1, :]
                   for h in range(heads)], axis=0)                  # [H, N, N]
    e = jnp.where(e > 0.0, e, _NEG_SLOPE * e)                       # LeakyReLU(0.2)
    e = jnp.where(adj_pos[None, :, :], e, _NEG_BIG)                 # finite mask
    m = jnp.max(e, axis=-1, keepdims=True)                          # kept for safety
    p = jnp.exp(e - m)                                              # non-edges -> 0
    s = jnp.sum(p, axis=-1, keepdims=True)
    alpha = p * pl.reciprocal(s, approx=True)                       # EUP reciprocal
    if out_transposed:
        # out[h, c, i] = sum_j feat[h, c, j] * alpha[h, i, j]
        return lax.dot_general(feat_t, alpha, (((2,), (2,)), ((0,), (0,))),
                               preferred_element_type=jnp.float32)  # [H, C, N]
    # out[h, i, c] = sum_j alpha[h, i, j] * feat[h, c, j]
    return lax.dot_general(alpha, feat_t, (((2,), (2,)), ((0,), (0,))),
                           preferred_element_type=jnp.float32)      # [H, N, C]


def gat_net_kernel(x_ref, adj_ref, p_ref, out_ref, *, heads1, c1, heads2, c2):
    f1 = x_ref.shape[1]
    f2 = heads1 * c1
    lay = _param_layout(f1, heads1, c1, heads2, c2)

    x = x_ref[...]                                # [N, f1]
    adj_pos = adj_ref[...] > 0.0                  # computed once, reused twice

    # ---- layer 1: GATConv(concat=True) + bias + ELU (stays in vregs) ----
    w1_all = p_ref[lay.off_w1:lay.off_w1 + lay.r1, 0:f1]
    o1 = _gat_layer(x, 1, adj_pos, w1_all, heads1, c1,
                    out_transposed=True)                            # [H1, C1, N]
    h1t = o1.reshape(f2, o1.shape[2]) \
        + p_ref[lay.off_b1:lay.off_b1 + f2, 0:1]                    # [H1*C1, N]
    # ELU (alpha=1); exp only sees clamped (<=0) inputs -> no transient inf.
    h1t = jnp.where(h1t > 0.0, h1t, jnp.exp(jnp.minimum(h1t, 0.0)) - 1.0)

    # ---- layer 2: GATConv(concat=False -> head mean) + bias + log_softmax ----
    w2_all = p_ref[lay.off_w2:lay.off_w2 + lay.r2, 0:f2]
    o2 = _gat_layer(h1t, 0, adj_pos, w2_all, heads2, c2,
                    out_transposed=False)                           # [H2, N, C2]
    logits = jnp.sum(o2, axis=0) * (1.0 / heads2) \
        + p_ref[lay.off_b2:lay.off_b2 + 1, 0:c2]                    # [N, C2]
    m = jnp.max(logits, axis=-1, keepdims=True)
    zc = logits - m
    out = zc - jnp.log(jnp.sum(jnp.exp(zc), axis=-1, keepdims=True))
    out_ref[...] = out.astype(out_ref.dtype)


def pack_gat_params(w1, att_src1, att_dst1, b1, w2, att_src2, att_dst2, b2):
    """Fold attention vectors into the weights and pack everything into ONE
    VMEM-friendly buffer.  Call once outside the per-step jit (weights are
    static between forward passes)."""
    f1 = w1.shape[0]
    heads1, c1 = att_src1.shape
    heads2, c2 = att_src2.shape
    f2 = heads1 * c1
    lay = _param_layout(f1, heads1, c1, heads2, c2)

    def _wbig(w, att_dst, att_src):
        fin = w.shape[0]
        h, c = att_src.shape
        w3 = w.reshape(fin, h, c)
        wa_dst = jnp.einsum("fhc,hc->hf", w3, att_dst)   # [H, Fin]
        wa_src = jnp.einsum("fhc,hc->hf", w3, att_src)   # [H, Fin]
        # rows: head-major feature weights | dst rows | src rows
        return jnp.concatenate([w.T, wa_dst, wa_src], axis=0)

    p = jnp.zeros((lay.total, lay.pw), jnp.float32)
    p = p.at[lay.off_w1:lay.off_w1 + lay.r1, 0:f1].set(_wbig(w1, att_dst1, att_src1))
    p = p.at[lay.off_b1:lay.off_b1 + f2, 0].set(b1)
    p = p.at[lay.off_w2:lay.off_w2 + lay.r2, 0:f2].set(_wbig(w2, att_dst2, att_src2))
    p = p.at[lay.off_b2, 0:c2].set(b2)
    return p


@functools.partial(jax.jit, static_argnames=("heads1", "c1", "heads2", "c2"))
def gat_net_forward(x, adj, packed, *, heads1, c1, heads2, c2):
    # F.dropout is the identity in eval mode.
    # TODO(synk): training-mode dropout (input + attention dropout) not implemented.
    n = x.shape[0]
    kernel = functools.partial(gat_net_kernel, heads1=heads1, c1=c1,
                               heads2=heads2, c2=c2)
    vmem = pl.BlockSpec(memory_space=pltpu.MemorySpace.VMEM)
    return pl.pallas_call(
        kernel,
        out_shape=jax.ShapeDtypeStruct((n, c2), jnp.float32),
        in_specs=[vmem, vmem, vmem],
        out_specs=vmem,
    )(x, adj, packed)


# ----------------------- pure-JAX reference (for checking) -----------------------
def _gat_layer_ref(x, adj, w, att_src, att_dst, bias, concat):
    n, _ = x.shape
    heads, c = att_src.shape
    feat = (x @ w).reshape(n, heads, c)
    a_src = jnp.einsum("nhc,hc->nh", feat, att_src)
    a_dst = jnp.einsum("nhc,hc->nh", feat, att_dst)
    outs = []
    for h in range(heads):
        e = a_dst[:, h][:, None] + a_src[:, h][None, :]
        e = jnp.where(e > 0, e, _NEG_SLOPE * e)
        e = jnp.where(adj > 0, e, _NEG_BIG)
        alpha = jax.nn.softmax(e, axis=1)
        outs.append(alpha @ feat[:, h])
    out = jnp.concatenate(outs, axis=1) if concat else sum(outs) / heads
    return out + bias


def _gat_net_ref(x, adj, p):
    h1 = jax.nn.elu(_gat_layer_ref(x, adj, p["w1"], p["att_src1"],
                                   p["att_dst1"], p["b1"], True))
    logits = _gat_layer_ref(h1, adj, p["w2"], p["att_src2"],
                            p["att_dst2"], p["b2"], False)
    return jax.nn.log_softmax(logits, axis=1)


if __name__ == "__main__":
    N = 16              # nodes
    num_features = 8    # dataset.num_features
    hidden = 8          # args.hidden
    heads = 4           # args.heads
    num_classes = 4     # dataset.num_classes
    output_heads = 1    # args.output_heads

    key = jax.random.PRNGKey(0)
    k = jax.random.split(key, 8)

    x = jax.random.normal(k[0], (N, num_features), jnp.float32)

    # Deterministic small graph: bidirectional ring. edge_index[0]=src, [1]=dst.
    src = jnp.arange(N)
    dst = (jnp.arange(N) + 1) % N
    edge_index = jnp.stack([jnp.concatenate([src, dst]),
                            jnp.concatenate([dst, src])], axis=0)  # [2, 2N]

    # Dense adjacency with self-loops: adj[i, j] = 1 iff edge j -> i.
    adj = jnp.zeros((N, N), jnp.float32).at[edge_index[1], edge_index[0]].set(1.0)
    adj = jnp.maximum(adj, jnp.eye(N, dtype=jnp.float32))

    def glorot(key, shape):
        fan_in, fan_out = shape[0], shape[1]
        lim = (6.0 / (fan_in + fan_out)) ** 0.5
        return jax.random.uniform(key, shape, jnp.float32, -lim, lim)

    params = {
        # conv1 = GATConv(num_features, hidden, heads=heads)  (concat=True)
        "w1": glorot(k[1], (num_features, heads * hidden)),
        "att_src1": glorot(k[2], (heads, hidden)),
        "att_dst1": glorot(k[3], (heads, hidden)),
        "b1": jnp.zeros((heads * hidden,), jnp.float32),
        # conv2 = GATConv(heads*hidden, num_classes, heads=output_heads, concat=False)
        "w2": glorot(k[4], (heads * hidden, output_heads * num_classes)),
        "att_src2": glorot(k[5], (output_heads, num_classes)),
        "att_dst2": glorot(k[6], (output_heads, num_classes)),
        "b2": jnp.zeros((num_classes,), jnp.float32),
    }

    # Fold + pack parameters ONCE (outside the per-step jit).
    packed = pack_gat_params(
        params["w1"], params["att_src1"], params["att_dst1"], params["b1"],
        params["w2"], params["att_src2"], params["att_dst2"], params["b2"])
    packed = jax.block_until_ready(packed)

    logits = gat_net_forward(x, adj, packed,
                             heads1=heads, c1=hidden,
                             heads2=output_heads, c2=num_classes)
    jax.block_until_ready(logits)
    assert logits.shape == (N, num_classes)

    ref = _gat_net_ref(x, adj, params)
    assert jnp.allclose(logits, ref, atol=1e-2, rtol=1e-2), \
        float(jnp.max(jnp.abs(logits - ref)))
    print("KERNEL_OK")
</pallas_src>

<mosaic_0001>
module attributes {stable_mosaic.version = 11 : i64} {
  func.func @gat_net_kernel(%arg0: memref<16x8xf32, #tpu.memory_space<vmem>>, %arg1: memref<16x16xf32, #tpu.memory_space<vmem>>, %arg2: memref<88x32xf32, #tpu.memory_space<vmem>>, %arg3: memref<16x4xf32, #tpu.memory_space<vmem>>) attributes {dimension_semantics = [], scalar_prefetch = 0 : i64, scratch_operands = 0 : i64, tpu.core_type = #tpu.core_type<tc>} {
    %c0 = arith.constant 0 : index
    %c0_0 = arith.constant 0 : index
    %0 = vector.load %arg0[%c0, %c0_0] : memref<16x8xf32, #tpu.memory_space<vmem>>, vector<16x8xf32>
    %c0_1 = arith.constant 0 : index
    %c0_2 = arith.constant 0 : index
    %1 = vector.load %arg1[%c0_1, %c0_2] : memref<16x16xf32, #tpu.memory_space<vmem>>, vector<16x16xf32>
    %cst = arith.constant 0.000000e+00 : f32
    %2 = vector.broadcast %cst : f32 to vector<16x16xf32>
    %3 = arith.cmpf ogt, %1, %2 : vector<16x16xf32>
    %c0_3 = arith.constant 0 : index
    %c0_4 = arith.constant 0 : index
    %4 = vector.load %arg2[%c0_3, %c0_4] : memref<88x32xf32, #tpu.memory_space<vmem>>, vector<40x8xf32>
    %cst_5 = arith.constant dense<0.000000e+00> : vector<40x16xf32>
    %5 = tpu.matmul %4, %0, %cst_5 {dimension_numbers = #tpu.dot_dimension_numbers<[1], [1], [0], [0], [0, 0, 1, 0], [], []>} : vector<40x8xf32>, vector<16x8xf32>, vector<40x16xf32> -> vector<40x16xf32>
    %6 = vector.extract_strided_slice %5 {offsets = [0, 0], sizes = [32, 16], strides = [1, 1]} : vector<40x16xf32> to vector<32x16xf32>
    %7 = vector.shape_cast %6 : vector<32x16xf32> to vector<4x8x16xf32>
    %8 = vector.extract_strided_slice %5 {offsets = [36, 0], sizes = [4, 16], strides = [1, 1]} : vector<40x16xf32> to vector<4x16xf32>
    %9 = vector.extract_strided_slice %4 {offsets = [32, 0], sizes = [4, 8], strides = [1, 1]} : vector<40x8xf32> to vector<4x8xf32>
    %cst_6 = arith.constant dense<0.000000e+00> : vector<16x4xf32>
    %10 = tpu.matmul %0, %9, %cst_6 {dimension_numbers = #tpu.dot_dimension_numbers<[1], [1], [0], [0], [0, 0, 1, 0], [], []>} : vector<16x8xf32>, vector<4x8xf32>, vector<16x4xf32> -> vector<16x4xf32>
    %11 = vector.extract_strided_slice %10 {offsets = [0, 0], sizes = [16, 1], strides = [1, 1]} : vector<16x4xf32> to vector<16x1xf32>
    %12 = vector.extract_strided_slice %8 {offsets = [0, 0], sizes = [1, 16], strides = [1, 1]} : vector<4x16xf32> to vector<1x16xf32>
    %13 = vector.broadcast %11 : vector<16x1xf32> to vector<16x16xf32>
    %14 = vector.broadcast %12 : vector<1x16xf32> to vector<16x16xf32>
    %15 = arith.addf %13, %14 : vector<16x16xf32>
    %16 = vector.extract_strided_slice %10 {offsets = [0, 1], sizes = [16, 1], strides = [1, 1]} : vector<16x4xf32> to vector<16x1xf32>
    %17 = vector.extract_strided_slice %8 {offsets = [1, 0], sizes = [1, 16], strides = [1, 1]} : vector<4x16xf32> to vector<1x16xf32>
    %18 = vector.broadcast %16 : vector<16x1xf32> to vector<16x16xf32>
    %19 = vector.broadcast %17 : vector<1x16xf32> to vector<16x16xf32>
    %20 = arith.addf %18, %19 : vector<16x16xf32>
    %21 = vector.extract_strided_slice %10 {offsets = [0, 2], sizes = [16, 1], strides = [1, 1]} : vector<16x4xf32> to vector<16x1xf32>
    %22 = vector.extract_strided_slice %8 {offsets = [2, 0], sizes = [1, 16], strides = [1, 1]} : vector<4x16xf32> to vector<1x16xf32>
    %23 = vector.broadcast %21 : vector<16x1xf32> to vector<16x16xf32>
    %24 = vector.broadcast %22 : vector<1x16xf32> to vector<16x16xf32>
    %25 = arith.addf %23, %24 : vector<16x16xf32>
    %26 = vector.extract_strided_slice %10 {offsets = [0, 3], sizes = [16, 1], strides = [1, 1]} : vector<16x4xf32> to vector<16x1xf32>
    %27 = vector.extract_strided_slice %8 {offsets = [3, 0], sizes = [1, 16], strides = [1, 1]} : vector<4x16xf32> to vector<1x16xf32>
    %28 = vector.broadcast %26 : vector<16x1xf32> to vector<16x16xf32>
    %29 = vector.broadcast %27 : vector<1x16xf32> to vector<16x16xf32>
    %30 = arith.addf %28, %29 : vector<16x16xf32>
    %31 = vector.shape_cast %15 : vector<16x16xf32> to vector<1x16x16xf32>
    %32 = vector.shape_cast %20 : vector<16x16xf32> to vector<1x16x16xf32>
    %33 = vector.shape_cast %25 : vector<16x16xf32> to vector<1x16x16xf32>
    %34 = vector.shape_cast %30 : vector<16x16xf32> to vector<1x16x16xf32>
    %35 = tpu.concatenate %31, %32, %33, %34 in 0 : vector<1x16x16xf32>, vector<1x16x16xf32>, vector<1x16x16xf32>, vector<1x16x16xf32> -> vector<4x16x16xf32>
    %cst_7 = arith.constant 0.000000e+00 : f32
    %36 = vector.broadcast %cst_7 : f32 to vector<4x16x16xf32>
    %37 = arith.cmpf ogt, %35, %36 : vector<4x16x16xf32>
    %cst_8 = arith.constant 2.000000e-01 : f32
    %38 = vector.broadcast %cst_8 : f32 to vector<4x16x16xf32>
    %39 = arith.mulf %38, %35 : vector<4x16x16xf32>
    %40 = arith.select %37, %35, %39 : vector<4x16x16xi1>, vector<4x16x16xf32>
    %41 = vector.shape_cast %3 : vector<16x16xi1> to vector<1x16x16xi1>
    %cst_9 = arith.constant -1.000000e+30 : f32
    %42 = vector.shape_cast %41 : vector<1x16x16xi1> to vector<1x16x16xi1>
    %43 = vector.broadcast %42 : vector<1x16x16xi1> to vector<4x16x16xi1>
    %44 = vector.broadcast %cst_9 : f32 to vector<4x16x16xf32>
    %45 = arith.select %43, %40, %44 : vector<4x16x16xi1>, vector<4x16x16xf32>
    %cst_10 = arith.constant dense<0xFF800000> : vector<4x16xf32>
    %46 = vector.multi_reduction <maximumf>, %45, %cst_10 [2] : vector<4x16x16xf32> to vector<4x16xf32>
    %47 = vector.shape_cast %46 : vector<4x16xf32> to vector<4x16x1xf32>
    %48 = vector.broadcast %47 : vector<4x16x1xf32> to vector<4x16x16xf32>
    %49 = arith.subf %45, %48 : vector<4x16x16xf32>
    %50 = math.exp %49 : vector<4x16x16xf32>
    %cst_11 = arith.constant dense<0.000000e+00> : vector<4x16xf32>
    %51 = vector.multi_reduction <add>, %50, %cst_11 [2] : vector<4x16x16xf32> to vector<4x16xf32>
    %52 = vector.shape_cast %51 : vector<4x16xf32> to vector<4x16x1xf32>
    %53 = tpu.reciprocal %52 {approx = true} : vector<4x16x1xf32> -> vector<4x16x1xf32>
    %54 = vector.broadcast %53 : vector<4x16x1xf32> to vector<4x16x16xf32>
    %55 = arith.mulf %50, %54 : vector<4x16x16xf32>
    %cst_12 = arith.constant dense<0.000000e+00> : vector<4x8x16xf32>
    %56 = tpu.matmul %7, %55, %cst_12 {dimension_numbers = #tpu.dot_dimension_numbers<[2], [2], [1], [1], [0, 0, 0, 1, 1, 1], [0], [0]>} : vector<4x8x16xf32>, vector<4x16x16xf32>, vector<4x8x16xf32> -> vector<4x8x16xf32>
    %57 = vector.shape_cast %56 : vector<4x8x16xf32> to vector<32x16xf32>
    %c40 = arith.constant 40 : index
    %c0_13 = arith.constant 0 : index
    %58 = vector.load %arg2[%c40, %c0_13] : memref<88x32xf32, #tpu.memory_space<vmem>>, vector<32x1xf32>
    %59 = vector.broadcast %58 : vector<32x1xf32> to vector<32x16xf32>
    %60 = arith.addf %57, %59 : vector<32x16xf32>
    %cst_14 = arith.constant 0.000000e+00 : f32
    %61 = vector.broadcast %cst_14 : f32 to vector<32x16xf32>
    %62 = arith.cmpf ogt, %60, %61 : vector<32x16xf32>
    %cst_15 = arith.constant 0.000000e+00 : f32
    %63 = vector.broadcast %cst_15 : f32 to vector<32x16xf32>
    %64 = arith.minimumf %60, %63 : vector<32x16xf32>
    %65 = math.exp %64 : vector<32x16xf32>
    %cst_16 = arith.constant 1.000000e+00 : f32
    %66 = vector.broadcast %cst_16 : f32 to vector<32x16xf32>
    %67 = arith.subf %65, %66 : vector<32x16xf32>
    %68 = arith.select %62, %60, %67 : vector<32x16xi1>, vector<32x16xf32>
    %c72 = arith.constant 72 : index
    %c0_17 = arith.constant 0 : index
    %69 = vector.load %arg2[%c72, %c0_17] : memref<88x32xf32, #tpu.memory_space<vmem>>, vector<6x32xf32>
    %cst_18 = arith.constant dense<0.000000e+00> : vector<6x16xf32>
    %70 = tpu.matmul %69, %68, %cst_18 {dimension_numbers = #tpu.dot_dimension_numbers<[1], [0], [0], [1], [0, 0, 1, 1], [], []>} : vector<6x32xf32>, vector<32x16xf32>, vector<6x16xf32> -> vector<6x16xf32>
    %71 = vector.extract_strided_slice %70 {offsets = [0, 0], sizes = [4, 16], strides = [1, 1]} : vector<6x16xf32> to vector<4x16xf32>
    %72 = vector.shape_cast %71 : vector<4x16xf32> to vector<1x4x16xf32>
    %73 = vector.extract_strided_slice %70 {offsets = [5, 0], sizes = [1, 16], strides = [1, 1]} : vector<6x16xf32> to vector<1x16xf32>
    %74 = vector.extract_strided_slice %69 {offsets = [4, 0], sizes = [1, 32], strides = [1, 1]} : vector<6x32xf32> to vector<1x32xf32>
    %cst_19 = arith.constant dense<0.000000e+00> : vector<16x1xf32>
    %75 = tpu.matmul %68, %74, %cst_19 {dimension_numbers = #tpu.dot_dimension_numbers<[0], [1], [1], [0], [0, 1, 1, 0], [], []>} : vector<32x16xf32>, vector<1x32xf32>, vector<16x1xf32> -> vector<16x1xf32>
    %76 = vector.broadcast %75 : vector<16x1xf32> to vector<16x16xf32>
    %77 = vector.broadcast %73 : vector<1x16xf32> to vector<16x16xf32>
    %78 = arith.addf %76, %77 : vector<16x16xf32>
    %79 = vector.shape_cast %78 : vector<16x16xf32> to vector<1x16x16xf32>
    %cst_20 = arith.constant 0.000000e+00 : f32
    %80 = vector.broadcast %cst_20 : f32 to vector<1x16x16xf32>
    %81 = arith.cmpf ogt, %79, %80 : vector<1x16x16xf32>
    %cst_21 = arith.constant 2.000000e-01 : f32
    %82 = vector.broadcast %cst_21 : f32 to vector<1x16x16xf32>
    %83 = arith.mulf %82, %79 : vector<1x16x16xf32>
    %84 = arith.select %81, %79, %83 : vector<1x16x16xi1>, vector<1x16x16xf32>
    %85 = vector.shape_cast %3 : vector<16x16xi1> to vector<1x16x16xi1>
    %cst_22 = arith.constant -1.000000e+30 : f32
    %86 = vector.broadcast %cst_22 : f32 to vector<1x16x16xf32>
    %87 = arith.select %85, %84, %86 : vector<1x16x16xi1>, vector<1x16x16xf32>
    %cst_23 = arith.constant dense<0xFF800000> : vector<1x16xf32>
    %88 = vector.multi_reduction <maximumf>, %87, %cst_23 [2] : vector<1x16x16xf32> to vector<1x16xf32>
    %89 = vector.shape_cast %88 : vector<1x16xf32> to vector<1x16x1xf32>
    %90 = vector.broadcast %89 : vector<1x16x1xf32> to vector<1x16x16xf32>
    %91 = arith.subf %87, %90 : vector<1x16x16xf32>
    %92 = math.exp %91 : vector<1x16x16xf32>
    %cst_24 = arith.constant dense<0.000000e+00> : vector<1x16xf32>
    %93 = vector.multi_reduction <add>, %92, %cst_24 [2] : vector<1x16x16xf32> to vector<1x16xf32>
    %94 = vector.shape_cast %93 : vector<1x16xf32> to vector<1x16x1xf32>
    %95 = tpu.reciprocal %94 {approx = true} : vector<1x16x1xf32> -> vector<1x16x1xf32>
    %96 = vector.broadcast %95 : vector<1x16x1xf32> to vector<1x16x16xf32>
    %97 = arith.mulf %92, %96 : vector<1x16x16xf32>
    %cst_25 = arith.constant dense<0.000000e+00> : vector<1x16x4xf32>
    %98 = tpu.matmul %97, %72, %cst_25 {dimension_numbers = #tpu.dot_dimension_numbers<[2], [2], [1], [1], [0, 0, 0, 1, 1, 1], [0], [0]>} : vector<1x16x16xf32>, vector<1x4x16xf32>, vector<1x16x4xf32> -> vector<1x16x4xf32>
    %cst_26 = arith.constant dense<0.000000e+00> : vector<16x4xf32>
    %99 = vector.multi_reduction <add>, %98, %cst_26 [0] : vector<1x16x4xf32> to vector<16x4xf32>
    %cst_27 = arith.constant 1.000000e+00 : f32
    %100 = vector.broadcast %cst_27 : f32 to vector<16x4xf32>
    %101 = arith.mulf %99, %100 : vector<16x4xf32>
    %c80 = arith.constant 80 : index
    %c0_28 = arith.constant 0 : index
    %102 = vector.load %arg2[%c80, %c0_28] : memref<88x32xf32, #tpu.memory_space<vmem>>, vector<1x4xf32>
    %103 = vector.broadcast %102 : vector<1x4xf32> to vector<16x4xf32>
    %104 = arith.addf %101, %103 : vector<16x4xf32>
    %cst_29 = arith.constant dense<0xFF800000> : vector<16xf32>
    %105 = vector.multi_reduction <maximumf>, %104, %cst_29 [1] : vector<16x4xf32> to vector<16xf32>
    %106 = vector.shape_cast %105 : vector<16xf32> to vector<16x1xf32>
    %107 = vector.broadcast %106 : vector<16x1xf32> to vector<16x4xf32>
    %108 = arith.subf %104, %107 : vector<16x4xf32>
    %109 = math.exp %108 : vector<16x4xf32>
    %cst_30 = arith.constant dense<0.000000e+00> : vector<16xf32>
    %110 = vector.multi_reduction <add>, %109, %cst_30 [1] : vector<16x4xf32> to vector<16xf32>
    %111 = vector.shape_cast %110 : vector<16xf32> to vector<16x1xf32>
    %112 = math.log %111 : vector<16x1xf32>
    %113 = vector.broadcast %112 : vector<16x1xf32> to vector<16x4xf32>
    %114 = arith.subf %108, %113 : vector<16x4xf32>
    %c0_31 = arith.constant 0 : index
    %c0_32 = arith.constant 0 : index
    %115 = vector.load %arg3[%c0_31, %c0_32] : memref<16x4xf32, #tpu.memory_space<vmem>>, vector<16x4xf32>
    tpu.vector_store %arg3[%c0_31, %c0_32], %114 {strides = array<i32>} : memref<16x4xf32, #tpu.memory_space<vmem>>, vector<16x4xf32>,
    return
  }
}

</mosaic_0001>

<bundles_post_ra>
// kernel: gat_net_forward.1
= control target key start
LH: loop header
LB: loop body
LE: loop exit
PB: predicated region body
PF: predicated region fallthrough
CT: control target
= control target key end

     0   :  { %vm25_vm0 = vcmask 64512   ;;  %v1330_v2 = vmov 0.0   ;;  %vm1331_vm1 = vmmov 0   ;;  %v1332_v4 = vmov 1   ;;  %s1547_s2 = inlined_call_operand.vmem [shape: f32[88,32], index: 2, kind: input, shape index: {}]   ;;  %s1548_s0 = inlined_call_operand.vmem [shape: f32[16,8], index: 0, kind: input, shape index: {}]   ;;  %s1549_s1 = inlined_call_operand.vmem [shape: f32[16,16], index: 1, kind: input, shape index: {}]   ;;  %s1550_s3 = inlined_call_operand.vmem [shape: f32[16,4], index: 3, kind: output, shape index: {}]  }
   0x1   :  { %v24_v0 = vld [vmem:[%s1547_s2 + $0x20] sm:$0xff]  ;;  %1187 = vmatprep.subr.mxu0 %v1330_v2  ;;  %1191 = vmatprep.mubr.msk.f32.mxu0 %vm1331_vm1, %v1330_v2  ;;  %v15_v3 = vld [vmem:[%s1548_s0 + $0x8] sm:$0xff]  ;;  %v1333_v5 = vmov 0   ;;  %v22_v8 = vld [vmem:[%s1547_s2 + $0x10] sm:$0xff]  ;;  %v1334_v15 = vmov 3   ;;  %v1335_v16 = vmov 2   ;;  %v222_v24 = vlaneseq }
   0x2   :  { %v14_v1 = vld [vmem:[%s1548_s0] sm:$0xff]  ;;  %1206 = vmatprep.subr.msk.mxu1 %vm25_vm0, %v24_v0  ;;  %1188 = vmatpush3.xpose.msk.msra.mxu0 %vm25_vm0, %v15_v3  ;;  %v21_v7 = vld [vmem:[%s1547_s2 + $0x8] sm:$0xff]  ;;  %v23_v9 = vld [vmem:[%s1547_s2 + $0x18] sm:$0xff]  ;;  %vm306_vm5 = vcmask 130048   ;;  %vm764_vm14 = vcmask 261120  }
   0x3   :  { %1208 = vmatprep.mubr.msk.f32.mxu1 %vm25_vm0, %v14_v1  ;;  %1207 = vmatpush3.xpose.msk.msra.mxu1 %vm25_vm0, %v24_v0  ;;  %v20_v6 = vld [vmem:[%s1547_s2] sm:$0xff]  ;;  %v1414_v25 = vshrl.u32 %v222_v24, 7  ;;  %v1423_v30 = vld [vmem:[%s1549_s1 + $0x8] sm:$0xff] }
   0x4   :  { %1189 = vmatprep.subr.mxu0 %v1330_v2  ;;  %1267 = vset.pattern.permute.xlu1 %v1332_v4  ;;  %vm19_vm2 = vcmp.gt.f32.partialorder %v1423_v30, 0.0  ;;  %v1430_v36 = vld [vmem:[%s1549_s1] sm:$0xff] }
   0x5   :  { %1266 = vset.pattern.permute.xlu0 %v1333_v5  ;;  %1211 = vmatprep.subr.mxu1 %v1330_v2  ;;  %v238_v26 = vsub.s32 5, %v1414_v25  ;;  %v224_v27 = vsub.s32 4, %v1414_v25  ;;  %v266_v35 = vsub.s32 7, %v1414_v25  ;;  %v252_v41 = vsub.s32 6, %v1414_v25 }
   0x6   :  { %1209 = vmatmul.mubr.msk.f32.vlgmr.msra.gmra.mxu1 %vm25_vm0, %v15_v3  ;;  %1190 = vmatpush3.xpose.msk.msra.mxu0 %vm25_vm0, %v14_v1  ;;  %vm18_vm6 = vcmp.gt.f32.partialorder %v1430_v36, 0.0 }
   0x7   :  { %1215 = vmatprep.mubr.msk.f32.mxu1 %vm1331_vm1, %v1330_v2  ;;  %1225 = vmatprep.subr.mxu0 %v1330_v2 }
   0x9   :  { %1192 = vmatmul.mubr.msk.f32.vlgmr.msra.gmra.mxu0 %vm25_vm0, %v20_v6 }
   0xa   :  { %1194 = vmatprep.mubr.msk.f32.mxu0 %vm1331_vm1, %v1330_v2 }
   0xd   :  { %1195 = vmatmul.mubr.msk.f32.gmra.mxu0 %vm25_vm0, %v21_v7 }
   0xe   :  { %1197 = vmatprep.mubr.msk.f32.mxu0 %vm1331_vm1, %v1330_v2 }
  0x11   :  { %1198 = vmatmul.mubr.msk.f32.gmra.mxu0 %vm25_vm0, %v22_v8 }
  0x12   :  { %1200 = vmatprep.mubr.msk.f32.mxu0 %vm1331_vm1, %v1330_v2 }
  0x15   :  { %1201 = vmatmul.mubr.msk.f32.gmra.mxu0 %vm25_vm0, %v23_v9 }
  0x16   :  { %1203 = vmatprep.mubr.msk.f32.mxu0 %vm1331_vm1, %v1330_v2 }
  0x19   :  { %1204 = vmatmul.mubr.msk.f32.gmra.mxu0 %vm25_vm0, %v24_v0 }
  0x1a   :  { %1229 = vmatprep.mubr.msk.f32.mxu0 %vm1331_vm1, %v1330_v2 }
  0xc6   :  { %v1210_v10 = vpop.f32.mrf.mxu1 }
  0xc7   :  { %233 = vperm.xlu1 %1267, %v1210_v10   ;;  %219 = vperm.xlu0 %1266, %v1210_v10  }
  0xc8   :  { %v203_v11 = vpop.f32.mrf.mxu1 }
  0xc9   :  { %v1406_v12 = vpop.f32.mrf.mxu0 }
  0xcb   :  { %229 = vperm.xlu1 %1267, %v203_v11   ;;  %214 = vperm.xlu0 %1266, %v203_v11   ;;  %v1193_v13 = vpop.f32.mrf.mxu0 }
  0xcd   :  { %v1408_v14 = vpop.f32.mrf.mxu0 }
  0xcf   :  { %1269 = vset.pattern.permute.xlu1 %v1334_v15  ;;  %1268 = vset.pattern.permute.xlu0 %v1335_v16  ;;  %v1196_v17 = vpop.f32.mrf.mxu0 }
  0xd0   :  { %261 = vperm.xlu1 %1269, %v1210_v10   ;;  %247 = vperm.xlu0 %1268, %v1210_v10  }
  0xd1   :  { %v1410_v18 = vpop.f32.mrf.mxu0 }
  0xd3   :  { %v1199_v19 = vpop.f32.mrf.mxu0 }
  0xd4   :  { %1270 = vset.pattern.permute.xlu1 %v1335_v16  ;;  %1271 = vset.pattern.permute.xlu0 %v1334_v15 }
  0xd5   :  { %243 = vperm.xlu1 %1270, %v203_v11   ;;  %257 = vperm.xlu0 %1271, %v203_v11   ;;  %v1412_v20 = vpop.f32.mrf.mxu0 }
  0xd7   :  { %v1202_v21 = vpop.f32.mrf.mxu0 }
  0xd9   :  { %1272 = vset.pattern.permute.xlu1 %v1333_v5  ;;  %1273 = vset.pattern.permute.xlu0 %v1333_v5  ;;  %v133_v22 = vpop.f32.mrf.mxu0 }
  0xda   :  { %v239_v28 = vrot.slane %v133_v22, %v238_v26  ;;  %v225_v29 = vrot.slane %v133_v22, %v224_v27  ;;  %v267_v50 = vrot.slane %v133_v22, %v266_v35  ;;  %v253_v51 = vrot.slane %v133_v22, %v252_v41 }
  0xdb   :  { %v1205_v23 = vpop.f32.mrf.mxu0 }
 0x142   :  { %v234_v31 = vpop.permute.xlu1 %233  ;;  %v220_v32 = vpop.permute.xlu0 %219 }
 0x143   :  { %v241_v33 = vadd.f32 %v239_v28, %v234_v31  ;;  %v227_v34 = vadd.f32 %v225_v29, %v220_v32 }
 0x145   :  { %v281_v37 = vmul.f32 0.2, %v241_v33  ;;  %v279_v38 = vmul.f32 0.2, %v227_v34  ;;  %vm271_vm3 = vcmp.gt.f32.partialorder %v227_v34, 0.0  ;;  %vm273_vm4 = vcmp.gt.f32.partialorder %v241_v33, 0.0 }
 0x146   :  { %v230_v39 = vpop.permute.xlu1 %229  ;;  %v215_v40 = vpop.permute.xlu0 %214 }
 0x147   :  { %v240_v42 = vadd.f32 %v239_v28, %v230_v39  ;;  %v226_v43 = vadd.f32 %v225_v29, %v215_v40  ;;  %v287_v44 = vsel %vm271_vm3, %v227_v34, %v279_v38  ;;  %v289_v45 = vsel %vm273_vm4, %v241_v33, %v281_v37 }
 0x148   :  { %v299_v46 = vsel %vm19_vm2, %v287_v44, -1e+30  ;;  %v301_v52 = vsel %vm19_vm2, %v289_v45, -1e+30 }
 0x149   :  { %v280_v47 = vmul.f32 0.2, %v240_v42  ;;  %v278_v48 = vmul.f32 0.2, %v226_v43  ;;  %v310_v49 = vsel %vm306_vm5, %v299_v46, -inf  ;;  %vm270_vm7 = vcmp.gt.f32.partialorder %v226_v43, 0.0 }
 0x14a   :  { %311 = vmax.xlane.f32.xlu1 %v310_v49  ;;  %vm272_vm8 = vcmp.gt.f32.partialorder %v240_v42, 0.0  ;;  %v316_v60 = vsel %vm306_vm5, %v301_v52, -inf }
 0x14b   :  { %v262_v53 = vpop.permute.xlu1 %261  ;;  %v248_v54 = vpop.permute.xlu0 %247  ;;  %v286_v55 = vsel %vm270_vm7, %v226_v43, %v278_v48  ;;  %v288_v56 = vsel %vm272_vm8, %v240_v42, %v280_v47 }
 0x14c   :  { %v269_v57 = vadd.f32 %v267_v50, %v262_v53  ;;  %v255_v58 = vadd.f32 %v253_v51, %v248_v54  ;;  %v298_v59 = vsel %vm18_vm6, %v286_v55, -1e+30  ;;  %v300_v62 = vsel %vm18_vm6, %v288_v56, -1e+30 }
 0x14d   :  { %v307_v61 = vsel %vm306_vm5, %v298_v59, -inf  ;;  %v313_v8 = vsel %vm306_vm5, %v300_v62, -inf }
 0x14e   :  { %v285_v63 = vmul.f32 0.2, %v269_v57  ;;  %v283_v0 = vmul.f32 0.2, %v255_v58  ;;  %317 = vmax.xlane.f32.xlu1 %v316_v60  ;;  %308 = vmax.xlane.f32.xlu0 %v307_v61  ;;  %vm275_vm9 = vcmp.gt.f32.partialorder %v255_v58, 0.0  ;;  %vm277_vm10 = vcmp.gt.f32.partialorder %v269_v57, 0.0 }
 0x150   :  { %v244_v1 = vpop.permute.xlu1 %243  ;;  %v258_v3 = vpop.permute.xlu0 %257  ;;  %v291_v4 = vsel %vm275_vm9, %v255_v58, %v283_v0  ;;  %v293_v5 = vsel %vm277_vm10, %v269_v57, %v285_v63 }
 0x151   :  { %v254_v6 = vadd.f32 %v253_v51, %v244_v1  ;;  %v268_v7 = vadd.f32 %v267_v50, %v258_v3  ;;  %v303_v9 = vsel %vm19_vm2, %v291_v4, -1e+30  ;;  %v305_v11 = vsel %vm19_vm2, %v293_v5, -1e+30 }
 0x152   :  { %314 = vmax.xlane.f32.xlu0 %v313_v8  ;;  %v322_v10 = vsel %vm306_vm5, %v303_v9, -inf  ;;  %v328_v16 = vsel %vm306_vm5, %v305_v11, -inf  ;;  %v713_v8 = vld [vmem:[%s1547_s2 + $0x38] sm:$0xff] }
 0x153   :  { %v282_v13 = vmul.f32 0.2, %v254_v6  ;;  %v284_v15 = vmul.f32 0.2, %v268_v7  ;;  %323 = vmax.xlane.f32.xlu1 %v322_v10  ;;  %vm274_vm11 = vcmp.gt.f32.partialorder %v254_v6, 0.0  ;;  %vm276_vm12 = vcmp.gt.f32.partialorder %v268_v7, 0.0 }
 0x155   :  { %v290_v17 = vsel %vm274_vm11, %v254_v6, %v282_v13  ;;  %v292_v19 = vsel %vm276_vm12, %v268_v7, %v284_v15  ;;  %v711_v6 = vld [vmem:[%s1547_s2 + $0x28] sm:$0xff]  ;;  %v712_v7 = vld [vmem:[%s1547_s2 + $0x30] sm:$0xff] }
 0x156   :  { %329 = vmax.xlane.f32.xlu0 %v328_v16  ;;  %v302_v21 = vsel %vm18_vm6, %v290_v17, -1e+30  ;;  %v304_v22 = vsel %vm18_vm6, %v292_v19, -1e+30 }
 0x157   :  { %v319_v23 = vsel %vm306_vm5, %v302_v21, -inf  ;;  %v325_v24 = vsel %vm306_vm5, %v304_v22, -inf }
 0x158   :  { %320 = vmax.xlane.f32.xlu1 %v319_v23 }
 0x15a   :  { %326 = vmax.xlane.f32.xlu0 %v325_v24 }
 0x1d3   :  { %v312_v27 = vpop.xlane.xlu1 %311 }
 0x1d4   :  { %v332_v28 = vsub.f32 %v299_v46, %v312_v27 }
 0x1d6   :  { %v341_v29 = vmul.f32 1.442695, %v332_v28 }
 0x1d7   :  { %v318_v31 = vpop.xlane.xlu1 %317  ;;  %v309_v32 = vpop.xlane.xlu0 %308 }
 0x1d8   :  { %1274 = vpow2.f32 %v341_v29  ;;  %v334_v33 = vsub.f32 %v301_v52, %v318_v31  ;;  %v331_v34 = vsub.f32 %v298_v59, %v309_v32 }
 0x1da   :  { %v345_v35 = vmul.f32 1.442695, %v334_v33  ;;  %v339_v37 = vmul.f32 1.442695, %v331_v34 }
 0x1db   :  { %v315_v38 = vpop.xlane.xlu0 %314 }
 0x1dc   :  { %1276 = vpow2.f32 %v345_v35  ;;  %v333_v39 = vsub.f32 %v300_v62, %v315_v38  ;;  %v324_v40 = vpop.xlane.xlu1 %323 }
 0x1dd   :  { %1278 = vpow2.f32 %v339_v37  ;;  %v336_v41 = vsub.f32 %v303_v9, %v324_v40  ;;  %v714_v9 = vld [vmem:[%s1547_s2 + $0x40] sm:$0xff] }
 0x1de   :  { %v343_v42 = vmul.f32 1.442695, %v333_v39 }
 0x1df   :  { %v349_v43 = vmul.f32 1.442695, %v336_v41  ;;  %v330_v44 = vpop.xlane.xlu0 %329 }
 0x1e0   :  { %1280 = vpow2.f32 %v343_v42  ;;  %v338_v45 = vsub.f32 %v305_v11, %v330_v44 }
 0x1e1   :  { %1282 = vpow2.f32 %v349_v43  ;;  %v321_v46 = vpop.xlane.xlu1 %320 }
 0x1e2   :  { %v353_v47 = vmul.f32 1.442695, %v338_v45  ;;  %v335_v48 = vsub.f32 %v302_v21, %v321_v46 }
 0x1e3   :  { %v327_v49 = vpop.xlane.xlu0 %326 }
 0x1e4   :  { %1284 = vpow2.f32 %v353_v47  ;;  %v347_v50 = vmul.f32 1.442695, %v335_v48  ;;  %v337_v51 = vsub.f32 %v304_v22, %v327_v49 }
 0x1e5   :  { %v1275_v52 = vpop.eup %1274 }
 0x1e6   :  { %1286 = vpow2.f32 %v347_v50  ;;  %v351_v53 = vmul.f32 1.442695, %v337_v51  ;;  %v358_v54 = vsel %vm306_vm5, %v1275_v52, 0.0 }
 0x1e7   :  { %359 = vadd.xlane.f32.xlu1 %v358_v54 }
 0x1e8   :  { %1288 = vpow2.f32 %v351_v53 }
 0x1e9   :  { %v1277_v55 = vpop.eup %1276 }
 0x1ea   :  { %v1279_v56 = vpop.eup %1278  ;;  %v364_v57 = vsel %vm306_vm5, %v1277_v55, 0.0 }
 0x1eb   :  { %365 = vadd.xlane.f32.xlu1 %v364_v57  ;;  %v355_v58 = vsel %vm306_vm5, %v1279_v56, 0.0 }
 0x1ec   :  { %356 = vadd.xlane.f32.xlu0 %v355_v58 }
 0x1ed   :  { %v1281_v59 = vpop.eup %1280 }
 0x1ee   :  { %v1283_v60 = vpop.eup %1282  ;;  %v361_v61 = vsel %vm306_vm5, %v1281_v59, 0.0 }
 0x1ef   :  { %v370_v62 = vsel %vm306_vm5, %v1283_v60, 0.0 }
 0x1f0   :  { %362 = vadd.xlane.f32.xlu0 %v361_v61  ;;  %371 = vadd.xlane.f32.xlu1 %v370_v62 }
 0x1f1   :  { %v1285_v63 = vpop.eup %1284 }
 0x1f2   :  { %v376_v0 = vsel %vm306_vm5, %v1285_v63, 0.0 }
 0x1f3   :  { %v1287_v1 = vpop.eup %1286 }
 0x1f4   :  { %377 = vadd.xlane.f32.xlu0 %v376_v0  ;;  %v367_v3 = vsel %vm306_vm5, %v1287_v1, 0.0  ;;  %v763_v0 = vld [vmem:[%s1547_s2 + $0x48] sm:$0x3f] }
 0x1f5   :  { %v1289_v4 = vpop.eup %1288  ;;  %368 = vadd.xlane.f32.xlu1 %v367_v3  ;;  %v870_v3 = vrot.slane %v763_v0, 4 }
 0x1f6   :  { %v373_v5 = vsel %vm306_vm5, %v1289_v4, 0.0 }
 0x1f8   :  { %374 = vadd.xlane.f32.xlu0 %v373_v5 }
 0x206   :  { %717 = vperm.xlu1 %1272, %v711_v6  }
 0x20a   :  { %727 = vperm.xlu1 %1272, %v713_v8  }
 0x20e   :  { %722 = vperm.xlu0 %1273, %v712_v7   ;;  %732 = vperm.xlu1 %1272, %v714_v9  }
 0x270   :  { %v360_v10 = vpop.xlane.xlu1 %359 }
 0x271   :  { %1290 = vrcp.f32 %v360_v10 }
 0x274   :  { %v366_v11 = vpop.xlane.xlu1 %365 }
 0x275   :  { %v357_v13 = vpop.xlane.xlu0 %356 }
 0x276   :  { %1292 = vrcp.f32 %v357_v13 }
 0x277   :  { %1294 = vrcp.f32 %v366_v11 }
 0x279   :  { %v363_v15 = vpop.xlane.xlu0 %362  ;;  %v372_v16 = vpop.xlane.xlu1 %371 }
 0x27a   :  { %1296 = vrcp.f32 %v372_v16 }
 0x27b   :  { %1298 = vrcp.f32 %v363_v15 }
 0x27d   :  { %v378_v17 = vpop.xlane.xlu0 %377 }
 0x27e   :  { %v1291_v19 = vpop.eup %1290  ;;  %v369_v21 = vpop.xlane.xlu1 %368 }
 0x27f   :  { %1300 = vrcp.f32 %v369_v21  ;;  %v388_v22 = vmul.f32 %v1291_v19, %v1275_v52 }
 0x280   :  { %1302 = vrcp.f32 %v378_v17 }
 0x281   :  { %v375_v23 = vpop.xlane.xlu0 %374  ;;  %1212 = vmatpush3.xpose.msk.msra.mxu1 %vm306_vm5, %v388_v22 }
 0x282   :  { %1213 = vmatprep.subr.mxu1 %v1330_v2  ;;  %1304 = vrcp.f32 %v375_v23 }
 0x283   :  { %v1293_v24 = vpop.eup %1292 }
 0x284   :  { %v387_v27 = vmul.f32 %v1293_v24, %v1279_v56  ;;  %v1295_v28 = vpop.eup %1294 }
 0x285   :  { %v390_v31 = vmul.f32 %v1295_v28, %v1277_v55 }
 0x286   :  { %1214 = vmatpush3.xpose.msk.msra.mxu1 %vm306_vm5, %v387_v27 }
 0x287   :  { %1218 = vmatprep.subr.mxu1 %v1330_v2  ;;  %v1297_v29 = vpop.eup %1296 }
 0x288   :  { %v1299_v32 = vpop.eup %1298  ;;  %v392_v33 = vmul.f32 %v1297_v29, %v1283_v60 }
 0x289   :  { %1216 = vmatmul.mubr.msk.f32.vlgmr.msra.gmra.mxu1 %vm306_vm5, %v1406_v12  ;;  %v389_v35 = vmul.f32 %v1299_v32, %v1281_v59  ;;  %v723_v45 = vpop.permute.xlu0 %722 }
 0x28a   :  { %1219 = vmatpush3.xpose.msk.msra.mxu1 %vm306_vm5, %v390_v31  ;;  %1222 = vmatprep.mubr.msk.f32.mxu1 %vm1331_vm1, %v1330_v2 }
 0x28b   :  { %1226 = vmatpush3.xpose.msk.msra.mxu0 %vm306_vm5, %v392_v33  ;;  %1220 = vmatprep.subr.mxu1 %v1330_v2 }
 0x28c   :  { %v1301_v34 = vpop.eup %1300  ;;  %1227 = vmatprep.subr.mxu0 %v1330_v2 }
 0x28d   :  { %v1303_v37 = vpop.eup %1302  ;;  %v391_v38 = vmul.f32 %v1301_v34, %v1287_v1 }
 0x28e   :  { %1221 = vmatpush3.xpose.msk.msra.mxu1 %vm306_vm5, %v389_v35  ;;  %v394_v12 = vmul.f32 %v1303_v37, %v1285_v63 }
 0x28f   :  { %1228 = vmatpush3.xpose.msk.msra.mxu0 %vm306_vm5, %v391_v38  ;;  %1232 = vmatprep.subr.mxu1 %v1330_v2  ;;  %v1305_v39 = vpop.eup %1304 }
 0x290   :  { %1239 = vmatprep.subr.mxu0 %v1330_v2  ;;  %v393_v40 = vmul.f32 %v1305_v39, %v1289_v4 }
 0x291   :  { %1223 = vmatmul.mubr.msk.f32.vlgmr.msra.gmra.mxu1 %vm306_vm5, %v1408_v14  ;;  %v718_v14 = vpop.permute.xlu1 %717 }
 0x292   :  { %1233 = vmatpush3.xpose.msk.msra.mxu1 %vm306_vm5, %v394_v12  ;;  %1230 = vmatmul.mubr.msk.f32.vlgmr.msra.gmra.mxu0 %vm306_vm5, %v1410_v18 }
 0x293   :  { %1234 = vmatprep.subr.mxu1 %v1330_v2  ;;  %1236 = vmatprep.mubr.msk.f32.mxu1 %vm1331_vm1, %v1330_v2 }
 0x294   :  { %1247 = vmatprep.mubr.msk.f32.mxu0 %vm1331_vm1, %v1330_v2 }
 0x295   :  { %v728_v48 = vpop.permute.xlu1 %727 }
 0x296   :  { %1235 = vmatpush3.xpose.msk.msra.mxu1 %vm306_vm5, %v393_v40 }
 0x297   :  { %1250 = vmatprep.subr.msk.mxu1 %vm764_vm14, %v870_v3 }
 0x299   :  { %1237 = vmatmul.mubr.msk.f32.vlgmr.msra.gmra.mxu1 %vm306_vm5, %v1412_v20  ;;  %v733_v20 = vpop.permute.xlu1 %732 }
 0x29a   :  { %1251 = vmatpush3.xpose.msk.msra.mxu1 %vm764_vm14, %v870_v3 }
 0x349   :  { %v470_v41 = vpop.f32.mrf.mxu1 }
 0x34a   :  { %v735_v42 = vadd.f32 %v718_v14, %v470_v41 }
 0x34b   :  { %v1217_v43 = vpop.f32.mrf.mxu1 }
 0x34c   :  { %v743_v44 = vmin.f32 %v735_v42, 0.0  ;;  %vm739_vm13 = vcmp.gt.f32.partialorder %v735_v42, 0.0 }
 0x34e   :  { %v747_v18 = vmul.f32 1.442695, %v743_v44 }
 0x350   :  { %1306 = vpow2.f32 %v747_v18 }
 0x351   :  { %v549_v46 = vpop.f32.mrf.mxu1 }
 0x352   :  { %v736_v47 = vadd.f32 %v723_v45, %v549_v46  ;;  %v628_v49 = vpop.f32.mrf.mxu0 }
 0x353   :  { %v1224_v50 = vpop.f32.mrf.mxu1  ;;  %v737_v51 = vadd.f32 %v728_v48, %v628_v49  ;;  %v1150_v49 = vld [vmem:[%s1547_s2 + $0x50] ss:$0 sm:$0xff] }
 0x354   :  { %v744_v52 = vmin.f32 %v736_v47, 0.0  ;;  %v1231_v53 = vpop.f32.mrf.mxu0  ;;  %vm740_vm15 = vcmp.gt.f32.partialorder %v736_v47, 0.0 }
 0x355   :  { %v745_v54 = vmin.f32 %v737_v51, 0.0  ;;  %vm741_vm0 = vcmp.gt.f32.partialorder %v737_v51, 0.0 }
 0x356   :  { %v749_v55 = vmul.f32 1.442695, %v744_v52 }
 0x357   :  { %v751_v56 = vmul.f32 1.442695, %v745_v54 }
 0x358   :  { %1308 = vpow2.f32 %v749_v55 }
 0x359   :  { %1310 = vpow2.f32 %v751_v56  ;;  %v707_v57 = vpop.f32.mrf.mxu1 }
 0x35a   :  { %v738_v58 = vadd.f32 %v733_v20, %v707_v57 }
 0x35b   :  { %v1238_v59 = vpop.f32.mrf.mxu1 }
 0x35c   :  { %v746_v60 = vmin.f32 %v738_v58, 0.0  ;;  %vm742_vm1 = vcmp.gt.f32.partialorder %v738_v58, 0.0 }
 0x35d   :  { %v1307_v61 = vpop.eup %1306 }
 0x35e   :  { %v753_v62 = vmul.f32 1.442695, %v746_v60  ;;  %v1142_v63 = vadd.f32 -1.0, %v1307_v61 }
 0x360   :  { %1312 = vpow2.f32 %v753_v62  ;;  %v759_v1 = vsel %vm739_vm13, %v735_v42, %v1142_v63 }
 0x361   :  { %838 = vxpose.xlu1.b32.start [1/4] (short) (narrow) %v759_v1, 16 }
 0x365   :  { %v1309_v4 = vpop.eup %1308 }
 0x366   :  { %v1311_v5 = vpop.eup %1310  ;;  %v1143_v6 = vadd.f32 -1.0, %v1309_v4 }
 0x367   :  { %v1144_v8 = vadd.f32 -1.0, %v1311_v5 }
 0x368   :  { %v760_v7 = vsel %vm740_vm15, %v736_v47, %v1143_v6 }
 0x369   :  { %839 = vxpose.xlu1.b32.cont [2/4] (short) (narrow) %v760_v7, 16  ;;  %v761_v9 = vsel %vm741_vm0, %v737_v51, %v1144_v8 }
 0x36d   :  { %v1313_v10 = vpop.eup %1312  ;;  %840 = vxpose.xlu1.b32.cont [3/4] (short) (narrow) %v761_v9, 16 }
 0x36e   :  { %v1145_v11 = vadd.f32 -1.0, %v1313_v10 }
 0x370   :  { %v762_v13 = vsel %vm742_vm1, %v738_v58, %v1145_v11 }
 0x371   :  { %1240 = vmatpush3.msra.mxu0 %v762_v13  ;;  %841 = vxpose.xlu1.b32.end [4/4] (short) (narrow) %v762_v13, 16 }
 0x372   :  { %1241 = vmatprep.subr.mxu0 %v1330_v2 }
 0x373   :  { %1242 = vmatpush3.msra.mxu0 %v761_v9 }
 0x374   :  { %1243 = vmatprep.subr.mxu0 %v1330_v2 }
 0x375   :  { %1244 = vmatpush3.msra.mxu0 %v760_v7 }
 0x376   :  { %1245 = vmatprep.subr.mxu0 %v1330_v2 }
 0x377   :  { %1246 = vmatpush3.msra.mxu0 %v759_v1 }
 0x378   :  { %1248 = vmatmul.mubr.msk.f32.vlgmr.msra.gmra.mxu0 %vm764_vm14, %v763_v0 }
 0x3e1   :  { %v854_v15 = vpop.trf.xlu1 }
 0x3e2   :  { %1252 = vmatprep.mubr.msk.f32.mxu1 %vm764_vm14, %v854_v15 }
 0x3e5   :  { %v855_v16 = vpop.trf.xlu1 }
 0x3e6   :  { %1253 = vmatmul.mubr.msk.f32.vlgmr.msra.gmra.mxu1 %vm764_vm14, %v855_v16 }
 0x438   :  { %v834_v17 = vpop.f32.mrf.mxu0 }
 0x439   :  { %1255 = vmatprep.subr.msk.mxu1 %vm306_vm5, %v834_v17  ;;  %v967_v2 = vrot.slane %v834_v17, %v238_v26 }
 0x43a   :  { %v1249_v19 = vpop.f32.mrf.mxu0  ;;  %1256 = vmatpush3.xpose.msk.msra.mxu1 %vm306_vm5, %v834_v17 }
 0x4a6   :  { %v1254_v21 = vpop.f32.mrf.mxu1 }
 0x4a8   :  { %v945_v22 = vpop.f32.mrf.mxu1 }
 0x4a9   :  { %956 = vperm.xlu0 %1273, %v945_v22  }
 0x4ad   :  { %961 = vperm.xlu0 %1273, %v1254_v21  }
 0x524   :  { %v957_v23 = vpop.permute.xlu0 %956 }
 0x525   :  { %v968_v24 = vadd.f32 %v967_v2, %v957_v23 }
 0x527   :  { %v972_v27 = vmul.f32 0.2, %v968_v24  ;;  %vm970_vm3 = vcmp.gt.f32.partialorder %v968_v24, 0.0 }
 0x528   :  { %v962_v28 = vpop.permute.xlu0 %961 }
 0x529   :  { %v969_v29 = vadd.f32 %v967_v2, %v962_v28  ;;  %v974_v31 = vsel %vm970_vm3, %v968_v24, %v972_v27 }
 0x52a   :  { %v976_v32 = vsel %vm18_vm6, %v974_v31, -1e+30 }
 0x52b   :  { %v973_v33 = vmul.f32 0.2, %v969_v29  ;;  %v978_v34 = vsel %vm306_vm5, %v976_v32, -inf  ;;  %vm971_vm4 = vcmp.gt.f32.partialorder %v969_v29, 0.0 }
 0x52c   :  { %979 = vmax.xlane.f32.xlu0 %v978_v34 }
 0x52d   :  { %v975_v35 = vsel %vm971_vm4, %v969_v29, %v973_v33 }
 0x52e   :  { %v977_v25 = vsel %vm19_vm2, %v975_v35, -1e+30  ;;  %vm1089_vm2 = vcmask 31744  }
 0x52f   :  { %v981_v26 = vsel %vm306_vm5, %v977_v25, -inf }
 0x530   :  { %982 = vmax.xlane.f32.xlu1 %v981_v26 }
 0x5b5   :  { %v980_v37 = vpop.xlane.xlu0 %979 }
 0x5b6   :  { %v984_v38 = vsub.f32 %v976_v32, %v980_v37 }
 0x5b8   :  { %v986_v12 = vmul.f32 1.442695, %v984_v38 }
 0x5b9   :  { %v983_v39 = vpop.xlane.xlu1 %982 }
 0x5ba   :  { %1314 = vpow2.f32 %v986_v12  ;;  %v985_v40 = vsub.f32 %v977_v25, %v983_v39 }
 0x5bc   :  { %v988_v36 = vmul.f32 1.442695, %v985_v40 }
 0x5be   :  { %1316 = vpow2.f32 %v988_v36 }
 0x5c7   :  { %v1315_v14 = vpop.eup %1314 }
 0x5c8   :  { %v990_v41 = vsel %vm306_vm5, %v1315_v14, 0.0 }
 0x5c9   :  { %991 = vadd.xlane.f32.xlu0 %v990_v41 }
 0x5cb   :  { %v1317_v42 = vpop.eup %1316 }
 0x5cc   :  { %v993_v43 = vsel %vm306_vm5, %v1317_v42, 0.0 }
 0x5cd   :  { %994 = vadd.xlane.f32.xlu0 %v993_v43 }
 0x652   :  { %v992_v30 = vpop.xlane.xlu0 %991 }
 0x653   :  { %1318 = vrcp.f32 %v992_v30 }
 0x656   :  { %v995_v44 = vpop.xlane.xlu0 %994 }
 0x657   :  { %1320 = vrcp.f32 %v995_v44 }
 0x660   :  { %v1319_v18 = vpop.eup %1318 }
 0x661   :  { %v998_v45 = vmul.f32 %v1319_v18, %v1315_v14 }
 0x663   :  { %1257 = vmatprep.mubr.msk.f32.mxu1 %vm306_vm5, %v998_v45 }
 0x664   :  { %v1321_v46 = vpop.eup %1320 }
 0x665   :  { %v999_v47 = vmul.f32 %v1321_v46, %v1317_v42 }
 0x667   :  { %1258 = vmatmul.mubr.msk.f32.vlgmr.msra.gmra.mxu1 %vm306_vm5, %v999_v47 }
 0x727   :  { %v1259_v48 = vpop.f32.mrf.mxu1 }
 0x728   :  { %v1086_v52 = vadd.f32 %v1259_v48, %v1150_v49 }
 0x729   :  { %v1080_v50 = vpop.f32.mrf.mxu1 }
 0x72a   :  { %v1081_v51 = vadd.f32 %v1150_v49, %v1080_v50  ;;  %v1093_v54 = vsel %vm1089_vm2, %v1086_v52, -inf }
 0x72c   :  { %v1090_v53 = vsel %vm1089_vm2, %v1081_v51, -inf }
 0x72d   :  { %1091 = vmax.xlane.f32.xlu0 %v1090_v53 }
 0x731   :  { %1094 = vmax.xlane.f32.xlu0 %v1093_v54 }
 0x7b6   :  { %v1092_v55 = vpop.xlane.xlu0 %1091 }
 0x7b7   :  { %v1096_v56 = vsub.f32 %v1081_v51, %v1092_v55 }
 0x7b9   :  { %v1098_v20 = vmul.f32 1.442695, %v1096_v56 }
 0x7ba   :  { %v1095_v57 = vpop.xlane.xlu0 %1094 }
 0x7bb   :  { %1322 = vpow2.f32 %v1098_v20  ;;  %v1097_v58 = vsub.f32 %v1086_v52, %v1095_v57 }
 0x7bd   :  { %v1100_v59 = vmul.f32 1.442695, %v1097_v58 }
 0x7bf   :  { %1324 = vpow2.f32 %v1100_v59 }
 0x7c8   :  { %v1323_v60 = vpop.eup %1322 }
 0x7c9   :  { %v1102_v61 = vsel %vm1089_vm2, %v1323_v60, 0.0 }
 0x7ca   :  { %1103 = vadd.xlane.f32.xlu0 %v1102_v61 }
 0x7cc   :  { %v1325_v62 = vpop.eup %1324 }
 0x7cd   :  { %v1105_v63 = vsel %vm1089_vm2, %v1325_v62, 0.0 }
 0x7ce   :  { %1106 = vadd.xlane.f32.xlu0 %v1105_v63 }
 0x853   :  { %v1104_v0 = vpop.xlane.xlu0 %1103 }
 0x854   :  { %1326 = vlog2.f32 %v1104_v0 }
 0x857   :  { %v1107_v1 = vpop.xlane.xlu0 %1106 }
 0x858   :  { %1328 = vlog2.f32 %v1107_v1 }
 0x861   :  { %v1327_v3 = vpop.eup %1326 }
 0x862   :  { %v1109_v4 = vmul.f32 0.6931472, %v1327_v3 }
 0x864   :  { %v1112_v5 = vsub.f32 %v1096_v56, %v1109_v4 }
 0x865   :  { %v1329_v6 = vpop.eup %1328 }
 0x866   :  { %1114 = vst.msk [vmem:[%s1550_s3] sm:$0xff] %vm1089_vm2, %v1112_v5  ;;  %v1111_v7 = vmul.f32 0.6931472, %v1329_v6 }
 0x868   :  { %v1113_v8 = vsub.f32 %v1097_v58, %v1111_v7 }
 0x86a   :  { %1115 = vst.msk [vmem:[%s1550_s3 + $0x8] sm:$0xff] %vm1089_vm2, %v1113_v8 }

</bundles_post_ra>
